<compile_context>
chip_gen: v5e
topology: v5e:2x2
jax: 0.10.0
libtpu: 0.0.40
codegen_flags: <defaults>
</compile_context>

<pallas_src>
import functools

import jax
import jax.numpy as jnp
from jax.experimental import pallas as pl
from jax.experimental.pallas import tpu as pltpu


def _round_up(x, m):
    return ((x + m - 1) // m) * m


def _device_kind():
    try:
        return jax.devices()[0].device_kind.lower()
    except Exception:
        return ""


def _vmem_budget_bytes():
    """Per-generation VMEM working-set budget (leave headroom below physical)."""
    kind = _device_kind()
    if "v7" in kind or "7x" in kind:
        return 48 * 1024 * 1024       # 64 MiB physical per TC on v7x
    if "v5" in kind or "v6" in kind:
        return 100 * 1024 * 1024      # 128 MiB physical on v5e/v6e
    return 48 * 1024 * 1024           # unknown generation: be conservative


def _feature_pad_multiple(max_dim):
    """v6e/v7x MXUs are 256x256; 128 is native only on v5e."""
    kind = _device_kind()
    if max_dim > 128 and ("v6" in kind or "v7" in kind or "7x" in kind):
        return 256
    return 128


def _working_set_bytes(tm, p, num_layers, weights_resident):
    """Approximate VMEM working set for the chosen tiling."""
    io = 2 * tm * p * 4 + 2 * tm * p * 4            # x + out, double-buffered f32
    act = tm * p * 2                                # resident bf16 activation
    if weights_resident:
        w = num_layers * p * p * 2 + num_layers * p * 4   # invariant, single-buffered
    else:
        w = 2 * (p * p * 2 + p * 4)                        # per-layer, double-buffered
    return io + act + w


def _mlp_fused_kernel(x_ref, w_ref, b_ref, o_ref, act_ref, *, w_resident):
    """Grid point (i, l): batch tile i, layer l.

    x_ref  : (TM, P) f32      padded input tile (layer-invariant block)
    w_ref  : (L, P, P) bf16   (resident) or (1, P, P) bf16 (streamed per layer)
    b_ref  : (L, 1, P) f32    (resident) or (1, 1, P) f32
    o_ref  : (TM, P)          output tile, written back once per batch tile
    act_ref: (TM, P) bf16     VMEM scratch carrying the activation across layers
    """
    l = pl.program_id(1)

    # First layer of this batch tile: seed the resident bf16 activation from x.
    @pl.when(l == 0)
    def _():
        act_ref[...] = x_ref[...].astype(act_ref.dtype)

    wl = w_ref[l] if w_resident else w_ref[0]   # (P, P) bf16
    bl = b_ref[l] if w_resident else b_ref[0]   # (1, P) f32

    # bf16 MXU matmul with f32 accumulation + fused f32 bias/ReLU epilogue
    # (every layer of the PyTorch module, including the last, is Linear+ReLU).
    h = jnp.dot(act_ref[...], wl, preferred_element_type=jnp.float32)
    h = jnp.maximum(h + bl, 0.0)
    act_ref[...] = h.astype(act_ref.dtype)

    # Only the final layer's activation leaves VMEM (f32, un-quantized).
    @pl.when(l == pl.num_programs(1) - 1)
    def _():
        o_ref[...] = h.astype(o_ref.dtype)


@functools.partial(jax.jit, static_argnames=("output_dim",))
def mlp_forward(x, w_stack, b_stack, *, output_dim):
    """x: (B, Din) f32;  w_stack: (L, P, P) bf16;  b_stack: (L, 1, P) f32."""
    B, Din = x.shape
    L, P, _ = w_stack.shape

    budget = _vmem_budget_bytes()

    # Weight residency: load the whole bf16 weight stack once per kernel when
    # it fits (removes (num_batch_tiles-1)/num_batch_tiles of weight traffic).
    weights_resident = _working_set_bytes(8, P, L, True) <= budget

    B8 = _round_up(B, 8)
    # Larger TM raises arithmetic intensity of the streamed-weight case; when
    # weights are resident, 256 rows fill the v6e/v7x MXU.
    tm = min(256 if weights_resident else 512, B8)
    # Keep >= 2 batch tiles when the batch allows, so v7x's 2nd TC gets work.
    if B8 >= 16 and B8 // tm < 2:
        tm = max(8, _round_up((B8 + 1) // 2, 8))
    # Shrink TM until the working set fits the per-generation VMEM budget.
    while tm > 8 and _working_set_bytes(tm, P, L, weights_resident) > budget:
        tm = max(8, (tm // 2) // 8 * 8)
    B_pad = _round_up(B8, tm)

    vmem_limit = int(min(
        budget,
        max(32 * 1024 * 1024,
            _working_set_bytes(tm, P, L, weights_resident) * 3 // 2
            + 2 * 1024 * 1024)))

    x_pad = jnp.zeros((B_pad, P), x.dtype).at[:B, :Din].set(x)

    if weights_resident:
        # Invariant blocks: DMA'd once, indexed by l inside the kernel.
        w_spec = pl.BlockSpec((L, P, P), lambda i, l: (0, 0, 0))
        b_spec = pl.BlockSpec((L, 1, P), lambda i, l: (0, 0, 0))
    else:
        # Streamed per layer (double-buffered while layer l-1 computes).
        w_spec = pl.BlockSpec((1, P, P), lambda i, l: (l, 0, 0))
        b_spec = pl.BlockSpec((1, 1, P), lambda i, l: (l, 0, 0))

    kernel = functools.partial(_mlp_fused_kernel, w_resident=weights_resident)

    out_pad = pl.pallas_call(
        kernel,
        out_shape=jax.ShapeDtypeStruct((B_pad, P), x.dtype),
        grid_spec=pltpu.PrefetchScalarGridSpec(
            num_scalar_prefetch=0,
            grid=(B_pad // tm, L),  # batch tiles outer, layers inner
            in_specs=[
                # x tile: invariant along the layer axis -> one HBM read/tile.
                pl.BlockSpec((tm, P), lambda i, l: (i, 0)),
                w_spec,
                b_spec,
            ],
            # Same block index across the layer axis -> output stays resident
            # in VMEM and is written back once per batch tile.
            out_specs=pl.BlockSpec((tm, P), lambda i, l: (i, 0)),
            scratch_shapes=[pltpu.VMEM((tm, P), jnp.bfloat16)],
        ),
        compiler_params=pltpu.CompilerParams(
            # batch tiles independent (megacore on v7x); the layer axis carries
            # the activation scratch so it must stay sequential.
            dimension_semantics=("parallel", "arbitrary"),
            vmem_limit_bytes=vmem_limit,
        ),
    )(x_pad, w_stack, b_stack)

    return out_pad[:B, :output_dim]


def init_mlp_params(key, input_dim, output_dim, num_layers, hidden_dim):
    """Matches the PyTorch module's layer shapes; W stored as (in, out)."""
    dims = [input_dim] + [hidden_dim] * (num_layers - 1) + [output_dim]
    params = []
    for i in range(len(dims) - 1):
        din, dout = dims[i], dims[i + 1]
        key, kw, kb = jax.random.split(key, 3)
        bound = 1.0 / jnp.sqrt(jnp.float32(din))  # nn.Linear default init
        w = jax.random.uniform(kw, (din, dout), jnp.float32, -bound, bound)
        b = jax.random.uniform(kb, (dout,), jnp.float32, -bound, bound)
        params.append((w, b))
    return params


def pack_params(params, pad_dim):
    """Zero-pad every (W, b); weights stored bf16 in HBM, bias stays f32."""
    L = len(params)
    w_stack = jnp.zeros((L, pad_dim, pad_dim), jnp.bfloat16)
    b_stack = jnp.zeros((L, 1, pad_dim), jnp.float32)
    for l, (w, b) in enumerate(params):
        din, dout = w.shape
        w_stack = w_stack.at[l, :din, :dout].set(w.astype(jnp.bfloat16))
        b_stack = b_stack.at[l, 0, :dout].set(b)
    return w_stack, b_stack


def mlp_reference_f32(x, params):
    # Pure f32 reference of the PyTorch module (every layer is Linear + ReLU).
    for w, b in params:
        x = jnp.maximum(x @ w + b, 0.0)
    return x


def mlp_reference_bf16(x, params):
    # Emulates the kernel numerics: bf16 operands, f32 accumulation, f32
    # bias+ReLU epilogue, bf16 activation carried between layers.
    h = x
    for w, b in params:
        h = jnp.dot(h.astype(jnp.bfloat16), w.astype(jnp.bfloat16),
                    preferred_element_type=jnp.float32)
        h = jnp.maximum(h + b, 0.0)
    return h


if __name__ == "__main__":
    input_dim, output_dim, num_layers, hidden_dim = 16, 8, 3, 32
    batch = 8

    key = jax.random.PRNGKey(0)
    key, kx = jax.random.split(key)
    x = jax.random.normal(kx, (batch, input_dim), jnp.float32)

    params = init_mlp_params(key, input_dim, output_dim, num_layers, hidden_dim)

    max_dim = max(input_dim, hidden_dim, output_dim)
    P = _round_up(max_dim, _feature_pad_multiple(max_dim))
    w_stack, b_stack = pack_params(params, P)

    out = mlp_forward(x, w_stack, b_stack, output_dim=output_dim)
    out = jax.block_until_ready(out)
    assert out.shape == (batch, output_dim)

    # Primary check: matches the kernel's bf16-operand / f32-accumulate math.
    ref_bf16 = mlp_reference_bf16(x, params)
    assert jnp.allclose(out, ref_bf16, atol=2e-3, rtol=2e-3), \
        "mismatch vs bf16-emulated reference"
    # Sanity check vs the exact f32 module (loose tolerance for bf16 weights).
    ref_f32 = mlp_reference_f32(x, params)
    assert jnp.allclose(out, ref_f32, atol=5e-2, rtol=5e-2), \
        "mismatch vs f32 reference"

    print("KERNEL_OK")
</pallas_src>

<mosaic_0001>
module attributes {stable_mosaic.version = 11 : i64} {
  func.func @_mlp_fused_kernel(%arg0: i32, %arg1: i32, %arg2: memref<8x128xf32, #tpu.memory_space<vmem>>, %arg3: memref<3x128x128xbf16, #tpu.memory_space<vmem>>, %arg4: memref<3x1x128xf32, #tpu.memory_space<vmem>>, %arg5: memref<8x128xf32, #tpu.memory_space<vmem>>, %arg6: memref<8x128xbf16, #tpu.memory_space<vmem>>) attributes {dimension_semantics = [#tpu.dimension_semantics<parallel>, #tpu.dimension_semantics<arbitrary>], iteration_bounds = array<i64: 1, 3>, scalar_prefetch = 0 : i64, scratch_operands = 1 : i64, tpu.core_type = #tpu.core_type<tc>, window_params = [{transform_indices = @transform_0, window_bounds = array<i64: 8, 128>}, {pipeline_mode = #tpu.pipeline_mode<synchronous>, transform_indices = @transform_1, window_bounds = array<i64: 3, 128, 128>}, {pipeline_mode = #tpu.pipeline_mode<synchronous>, transform_indices = @transform_2, window_bounds = array<i64: 3, 1, 128>}, {transform_indices = @transform_3, window_bounds = array<i64: 8, 128>}]} {
    %c0_i32 = arith.constant 0 : i32
    %0 = arith.cmpi eq, %arg1, %c0_i32 : i32
    %1 = arith.extui %0 : i1 to i32
    %c0_i32_0 = arith.constant 0 : i32
    %2 = arith.cmpi ne, %1, %c0_i32_0 : i32
    scf.if %2 {
      %c0_10 = arith.constant 0 : index
      %c0_11 = arith.constant 0 : index
      %20 = vector.load %arg2[%c0_10, %c0_11] : memref<8x128xf32, #tpu.memory_space<vmem>>, vector<8x128xf32>
      %21 = arith.truncf %20 : vector<8x128xf32> to vector<8x128xbf16>
      %c0_12 = arith.constant 0 : index
      %c0_13 = arith.constant 0 : index
      %22 = vector.load %arg6[%c0_12, %c0_13] : memref<8x128xbf16, #tpu.memory_space<vmem>>, vector<8x128xbf16>
      tpu.vector_store %arg6[%c0_12, %c0_13], %21 {strides = array<i32>} : memref<8x128xbf16, #tpu.memory_space<vmem>>, vector<8x128xbf16>,
    } else {
    }
    %3 = arith.index_cast %arg1 : i32 to index
    %c0 = arith.constant 0 : index
    %c0_1 = arith.constant 0 : index
    %4 = vector.load %arg3[%3, %c0, %c0_1] : memref<3x128x128xbf16, #tpu.memory_space<vmem>>, vector<1x128x128xbf16>
    %5 = vector.shape_cast %4 : vector<1x128x128xbf16> to vector<128x128xbf16>
    %6 = arith.index_cast %arg1 : i32 to index
    %c0_2 = arith.constant 0 : index
    %c0_3 = arith.constant 0 : index
    %7 = vector.load %arg4[%6, %c0_2, %c0_3] : memref<3x1x128xf32, #tpu.memory_space<vmem>>, vector<1x1x128xf32>
    %8 = vector.shape_cast %7 : vector<1x1x128xf32> to vector<1x128xf32>
    %c0_4 = arith.constant 0 : index
    %c0_5 = arith.constant 0 : index
    %9 = vector.load %arg6[%c0_4, %c0_5] : memref<8x128xbf16, #tpu.memory_space<vmem>>, vector<8x128xbf16>
    %cst = arith.constant dense<0.000000e+00> : vector<8x128xf32>
    %10 = tpu.matmul %9, %5, %cst {dimension_numbers = #tpu.dot_dimension_numbers<[1], [0], [0], [1], [0, 0, 1, 1], [], []>} : vector<8x128xbf16>, vector<128x128xbf16>, vector<8x128xf32> -> vector<8x128xf32>
    %11 = vector.broadcast %8 : vector<1x128xf32> to vector<8x128xf32>
    %12 = arith.addf %10, %11 : vector<8x128xf32>
    %cst_6 = arith.constant 0.000000e+00 : f32
    %13 = vector.broadcast %cst_6 : f32 to vector<8x128xf32>
    %14 = arith.maximumf %12, %13 : vector<8x128xf32>
    %15 = arith.truncf %14 : vector<8x128xf32> to vector<8x128xbf16>
    %c0_7 = arith.constant 0 : index
    %c0_8 = arith.constant 0 : index
    %16 = vector.load %arg6[%c0_7, %c0_8] : memref<8x128xbf16, #tpu.memory_space<vmem>>, vector<8x128xbf16>
    tpu.vector_store %arg6[%c0_7, %c0_8], %15 {strides = array<i32>} : memref<8x128xbf16, #tpu.memory_space<vmem>>, vector<8x128xbf16>,
    %c2_i32 = arith.constant 2 : i32
    %17 = arith.cmpi eq, %arg1, %c2_i32 : i32
    %18 = arith.extui %17 : i1 to i32
    %c0_i32_9 = arith.constant 0 : i32
    %19 = arith.cmpi ne, %18, %c0_i32_9 : i32
    scf.if %19 {
      %c0_10 = arith.constant 0 : index
      %c0_11 = arith.constant 0 : index
      %20 = vector.load %arg5[%c0_10, %c0_11] : memref<8x128xf32, #tpu.memory_space<vmem>>, vector<8x128xf32>
      tpu.vector_store %arg5[%c0_10, %c0_11], %14 {strides = array<i32>} : memref<8x128xf32, #tpu.memory_space<vmem>>, vector<8x128xf32>,
    } else {
    }
    return
  }
  func.func @transform_0(%arg0: i32, %arg1: i32) -> (i32, i32) {
    %c0_i32 = arith.constant 0 : i32
    %c0_i32_0 = arith.constant 0 : i32
    return %arg0, %c0_i32 : i32, i32
  }
  func.func @transform_1(%arg0: i32, %arg1: i32) -> (i32, i32, i32) {
    %c0_i32 = arith.constant 0 : i32
    %c0_i32_0 = arith.constant 0 : i32
    %c0_i32_1 = arith.constant 0 : i32
    %c0_i32_2 = arith.constant 0 : i32
    return %c0_i32, %c0_i32_0, %c0_i32_1 : i32, i32, i32
  }
  func.func @transform_2(%arg0: i32, %arg1: i32) -> (i32, i32, i32) {
    %c0_i32 = arith.constant 0 : i32
    %c0_i32_0 = arith.constant 0 : i32
    %c0_i32_1 = arith.constant 0 : i32
    %c0_i32_2 = arith.constant 0 : i32
    return %c0_i32, %c0_i32_0, %c0_i32_1 : i32, i32, i32
  }
  func.func @transform_3(%arg0: i32, %arg1: i32) -> (i32, i32) {
    %c0_i32 = arith.constant 0 : i32
    %c0_i32_0 = arith.constant 0 : i32
    return %arg0, %c0_i32 : i32, i32
  }
}

</mosaic_0001>

<bundles_post_ra>
// kernel: mlp_forward.1
= control target key start
LH: loop header
LB: loop body
LE: loop exit
PB: predicated region body
PF: predicated region fallthrough
CT: control target
= control target key end

     0   :  { %8 = vsyncpa [#allocation4], 0  ;;  %s632_s0 = inlined_call_operand.vmem [shape: f32[8,128], index: 0, kind: input, shape index: {}]   ;;  %s633_s1 = inlined_call_operand.hbm [shape: bf16[3,128,128], index: 1, kind: input, shape index: {}]   ;;  %s634_s2 = inlined_call_operand.vmem [shape: f32[3,1,128], index: 2, kind: input, shape index: {}]   ;;  %s635_s3 = inlined_call_operand.hbm [shape: f32[8,128], index: 3, kind: output, shape index: {}]  }
   0x1   :  { %9 = vsyncpa [#allocation5], 0  ;;  %s582_s12 = smov 0   ;;  %s584_s13 = smov 0  }
   0x2   :  { %s586_s14 = smov 0  }
   0x3 LB: > { %s368_s15 = sadd.s32 4294967295, %s556_s14   ;;  %s24_s16 = sadd.s32 1, %s552_s13  ;;  %s556_s14 = sphi %s586_s14, %s15_s14   ;;  %s552_s13 = sphi %s584_s13, %s637_s13   ;;  %s548_s12 = sphi %s582_s12, %s636_s12  }
   0x4   : > { %p25_p0 = scmp.ge.s32.totalorder %s24_s16, 3  ;;  %p369_p1 = scmp.ge.s32.totalorder %s556_s14, 1 }
   0x5   : > { %p126_p2 = scmp.lt.s32.totalorder %s556_s14, 4  ;;  %p435_p4 = scmp.eq.s32.totalorder %s368_s15, 0 }
   0x6   : > { %s639_s16 = smov (%p25_p0, %s24_s16), 0  ;;  %s144_s19 = sshll.u32 %s633_s1, 4  ;;  %s145_s19 = int_to_ptr.hbm [resolvable:$true] %s144_s19 }
   0x7   : > { %p127_p3 = pnand %p369_p1, %p126_p2  ;;  %s558_s20 = smov [#allocation3]  }
   0x8   : > { %s146_s21 = sshll.u32 %s558_s20, 4  ;;  %s559_s22 = smov 64   ;;  %s147_s21 = int_to_ptr.vmem [resolvable:$true] %s146_s21 }
   0x9   : > { %p431_p5 = pneg %p127_p3  ;;  %s560_s23 = smov 4  }
   0xa   : > { %165 = sbr.rel (%p127_p3) target bundleno = 202 (0xca), region = 32 }
   0xb   : > { %p432_p6 = pnand %p435_p4, %p431_p5 }
   0xd   : > { %434 = dma.hbm_to_vmem [thread:$0]  (!%p432_p6), %s145_s19, 3072, %s147_s21, [#allocation4], %s559_s22, %s559_s22, %s560_s23  }
   0xf   : > { %539 = dma.done.wait (%p435_p4), [#allocation4], 3072  }
  0x10   : > { %541 = vsyncadd (%p435_p4), [#allocation4], 4294964224  ;;  %p374_p7 = scmp.ne.s32.totalorder %s548_s12, 0 }
  0x12   : > { %191 = sbr.rel (%p374_p7) target bundleno = 27 (0x1b), region = 40 }
  0x17   : > { %v192_v0 = vld [vmem:[%s632_s0] sm:$0xff] }
  0x18   : > { %v193_v1 = vpack.c.bf16 %v192_v0, %v192_v0 }
  0x1a   : > { %194 = vst [vmem:[#allocation2] sm:$0xf] %v193_v1 }
  0x1b PF: > { %s414_s26 = sshll.u32 %s548_s12, 6  ;;  %s214_s29 = scalar_lea.vmem %s634_s2, %s548_s12 }
  0x1c   : > { %s197_s30 = scalar_lea.vmem [#allocation3], %s414_s26  ;;  %v467_v11 = vld [vmem:[%s214_s29] ss:$0 sm:$0xff]  ;;  %p409_p8 = scmp.ne.s32.totalorder %s548_s12, 2 }
  0x1d   : > { %v422_v2 = vld [vmem:[%s197_s30 + $0x38] sm:$0xff]  ;;  %v421_v3 = vld [vmem:[%s197_s30 + $0x30] sm:$0xff]  ;;  %v420_v4 = vld [vmem:[%s197_s30 + $0x28] sm:$0xff] }
  0x1e   : > { %268 = vmatpush.bf16.msra.mxu0 %v422_v2  ;;  %v419_v5 = vld [vmem:[%s197_s30 + $0x20] sm:$0xff]  ;;  %v418_v6 = vld [vmem:[%s197_s30 + $0x18] sm:$0xff]  ;;  %v417_v7 = vld [vmem:[%s197_s30 + $0x10] sm:$0xff] }
  0x1f   : > { %v416_v8 = vld [vmem:[%s197_s30 + $0x8] sm:$0xff]  ;;  %v415_v9 = vld [vmem:[%s197_s30] sm:$0xff] }
  0x21   : > { %v216_v10 = vld [vmem:[#allocation2] sm:$0xf] }
  0x22   : > { %269 = vmatpush.bf16.msra.mxu0 %v421_v3 }
  0x26   : > { %270 = vmatpush.bf16.msra.mxu0 %v420_v4 }
  0x2a   : > { %271 = vmatpush.bf16.msra.mxu0 %v419_v5 }
  0x2e   : > { %272 = vmatpush.bf16.msra.mxu0 %v418_v6 }
  0x32   : > { %273 = vmatpush.bf16.msra.mxu0 %v417_v7 }
  0x36   : > { %274 = vmatpush.bf16.msra.mxu0 %v416_v8 }
  0x3a   : > { %275 = vmatpush.bf16.msra.mxu0 %v415_v9 }
  0x3d   : > { %276 = vmatmul.bf16.vlgmr.msra.gmra.mxu0 %v216_v10 }
  0xba   : > { %v277_v12 = vpop.f32.mrf.mxu0 }
  0xbb   : > { %v278_v13 = vadd.f32 %v467_v11, %v277_v12 }
  0xbd   : > { %v281_v14 = vmax.f32 %v278_v13, 0.0 }
  0xbe   : > { %287 = sbr.rel (%p409_p8) target bundleno = 196 (0xc4), region = 44 }
  0xbf   : > { %v282_v15 = vpack.c.bf16 %v281_v14, %v281_v14 }
  0xc1   : > { %283 = vst [vmem:[#allocation2] sm:$0xf] %v282_v15 }
  0xc2   : > { %v279_v16 = vpop.f32.mrf.mxu0 }
  0xc3   : > { %288 = vst [vmem:[#allocation6] sm:$0xff] %v281_v14 }
  0xc4 PF: > { %p437_p9 = scmp.eq.s32.totalorder %s368_s15, 2  ;;  %s299_s6 = sshll.u32 %s635_s3, 4  ;;  %s300_s6 = int_to_ptr.hbm [resolvable:$true] %s299_s6 }
  0xc5   : > { %s561_s7 = smov [#allocation6]  }
  0xc6   : > { %s297_s8 = sshll.u32 %s561_s7, 4  ;;  %s298_s8 = int_to_ptr.vmem [resolvable:$true] %s297_s8 }
  0xc7   : > { %428 = dma.vmem_to_hbm [thread:$0]  (%p437_p9), %s298_s8, 128, %s300_s6, [#allocation5]  }
  0xc8   : > { %543 = dma.done.wait (%p437_p9), [#allocation5], 128  }
  0xc9   : > { %545 = vsyncadd (%p437_p9), [#allocation5], 4294967168 }
  0xca PF: > { %s15_s14 = sadd.s32 1, %s556_s14   ;;  %s636_s12 = smov %s552_s13 }
  0xcb   : > { %p12_p10 = scmp.ge.s32.totalorder %s15_s14, 5   ;;  %s637_s13 = smov %s639_s16 }
  0xcd   :  { %14 = sbr.rel (!%p12_p10) target bundleno = 3 (0x3), region = 75 }
  0xd2   :  { %313 = vsyncpa [#allocation4], 1 }
  0xd3   :  { %315 = vsyncpa [#allocation4 + $0x1], 1 }
  0xd4   :  { %316 = vsyncpa [#allocation5], 1 }
  0xd5   :  { %318 = vsyncpa [#allocation5 + $0x1], 1 }

</bundles_post_ra>
